<compile_context>
chip_gen: v7x
topology: tpu7x:2x2x1
jax: 0.10.0
libtpu: 0.0.40
codegen_flags: <defaults>
</compile_context>

<pallas_src>
import functools

import numpy as np
import jax
import jax.numpy as jnp
from jax.experimental import pallas as pl
from jax.experimental.pallas import tpu as pltpu

LN_EPS = 1e-5  # nn.LayerNorm default


# --------------------------------------------------------------------------------------
# Generic row-tiled dense kernel:   out = act(LN(x) @ W + b) (+ residual)
# --------------------------------------------------------------------------------------

def _dense_kernel(*refs, has_ln, act, has_residual):
    idx = 0
    x_ref = refs[idx]; idx += 1
    if has_ln:
        g_ref = refs[idx]; bln_ref = refs[idx + 1]; idx += 2
    w_ref = refs[idx]; idx += 1
    b_ref = refs[idx]; idx += 1
    if has_residual:
        r_ref = refs[idx]; idx += 1
    o_ref = refs[idx]

    x = x_ref[...].astype(jnp.float32)
    if has_ln:
        mu = jnp.mean(x, axis=-1, keepdims=True)
        var = jnp.mean(jnp.square(x - mu), axis=-1, keepdims=True)
        x = (x - mu) * jax.lax.rsqrt(var + LN_EPS)
        x = x * g_ref[...].astype(jnp.float32) + bln_ref[...].astype(jnp.float32)

    y = jnp.dot(x.astype(w_ref.dtype), w_ref[...], preferred_element_type=jnp.float32)
    y = y + b_ref[...].astype(jnp.float32)

    if act == "gelu":
        # tanh-approx GELU: transcendental goes to the EUP slot instead of a VALU erf poly.
        y = 0.5 * y * (1.0 + jnp.tanh(0.7978845608028654 * (y + 0.044715 * y * y * y)))

    if has_residual:
        y = y + r_ref[...].astype(jnp.float32)

    o_ref[...] = y.astype(o_ref.dtype)


def dense(x2d, w, b=None, *, ln=None, act=None, residual=None, tm=512):
    """Row-tiled dense: out = act(LN(x) @ w + b) (+ residual)."""
    n, din = x2d.shape
    dout = w.shape[1]
    tm = n if n <= tm else tm          # full rows if small, else 512-row tiles (mult of 8)
    grid = (pl.cdiv(n, tm),)

    args = [x2d]
    in_specs = [pl.BlockSpec((tm, din), lambda i: (i, 0))]
    if ln is not None:
        g, bt = ln
        args += [g.reshape(1, din), bt.reshape(1, din)]
        in_specs += [pl.BlockSpec((1, din), lambda i: (0, 0)),
                     pl.BlockSpec((1, din), lambda i: (0, 0))]
    args.append(w)
    in_specs.append(pl.BlockSpec((din, dout), lambda i: (0, 0)))   # weight stays resident
    if b is None:
        b = jnp.zeros((dout,), x2d.dtype)
    args.append(b.reshape(1, dout))
    in_specs.append(pl.BlockSpec((1, dout), lambda i: (0, 0)))
    if residual is not None:
        args.append(residual)
        in_specs.append(pl.BlockSpec((tm, dout), lambda i: (i, 0)))

    kern = functools.partial(_dense_kernel, has_ln=ln is not None, act=act,
                             has_residual=residual is not None)
    return pl.pallas_call(
        kern,
        out_shape=jax.ShapeDtypeStruct((n, dout), x2d.dtype),
        grid=grid,
        in_specs=in_specs,
        out_specs=pl.BlockSpec((tm, dout), lambda i: (i, 0)),
        compiler_params=pltpu.CompilerParams(dimension_semantics=("parallel",)),
    )(*args)


# --------------------------------------------------------------------------------------
# Window attention kernel: one grid step = a batch of windows, all heads.
# --------------------------------------------------------------------------------------

def _window_attn_kernel(*refs, num_heads, scale, has_mask):
    if has_mask:
        q_ref, k_ref, v_ref, bias_ref, mask_ref, o_ref = refs
    else:
        q_ref, k_ref, v_ref, bias_ref, o_ref = refs
        mask_ref = None

    q = q_ref[...].astype(jnp.float32) * scale   # (wb, t, C)
    k = k_ref[...].astype(jnp.float32)
    v = v_ref[...].astype(jnp.float32)
    c = q.shape[-1]
    hd = c // num_heads

    if has_mask:
        mask = mask_ref[...].astype(jnp.float32)  # (wb, t, t)

    outs = []
    for h in range(num_heads):
        sl = slice(h * hd, (h + 1) * hd)
        # contract head_dim directly (no k.T / XLU transpose)
        s = jnp.einsum("wqd,wkd->wqk", q[..., sl], k[..., sl],
                       preferred_element_type=jnp.float32)
        s = s + bias_ref[h]                       # (t, t) broadcasts over windows
        if has_mask:
            s = s + mask
        s = s - jnp.max(s, axis=-1, keepdims=True)
        p = jnp.exp(s)
        p = p * pl.reciprocal(jnp.sum(p, axis=-1, keepdims=True), approx=True)
        outs.append(jnp.einsum("wqk,wkd->wqd", p, v[..., sl],
                               preferred_element_type=jnp.float32))

    # single lane-dense (wb, t, C) store
    o_ref[...] = jnp.concatenate(outs, axis=-1).astype(o_ref.dtype)


def _pick_window_block(nw_img, t, c, itemsize, budget=8 * 1024 * 1024):
    # q,k,v,out double-buffered + per-window score/mask working set
    per_win = t * c * itemsize * 8 + t * t * itemsize * 2
    wb = max(1, min(nw_img, budget // max(per_win, 1)))
    while nw_img % wb:
        wb -= 1
    return wb


def window_attention(q, k, v, rel_bias, mask, *, num_heads, scale, nw_img):
    # q, k, v: (nw_tot, t, C); rel_bias: (num_heads, t, t); mask: (nw_img, t, t) or None
    nw_tot, t, c = q.shape
    wb = _pick_window_block(nw_img, t, c, q.dtype.itemsize)
    grid = (nw_tot // wb,)

    in_specs = [pl.BlockSpec((wb, t, c), lambda w: (w, 0, 0)),
                pl.BlockSpec((wb, t, c), lambda w: (w, 0, 0)),
                pl.BlockSpec((wb, t, c), lambda w: (w, 0, 0)),
                pl.BlockSpec((num_heads, t, t), lambda w: (0, 0, 0))]
    args = [q, k, v, rel_bias]
    has_mask = mask is not None
    if has_mask:
        blocks_per_img = nw_img // wb
        in_specs.append(
            pl.BlockSpec((wb, t, t), lambda w: (w % blocks_per_img, 0, 0)))
        args.append(mask)

    kern = functools.partial(_window_attn_kernel, num_heads=num_heads,
                             scale=scale, has_mask=has_mask)
    return pl.pallas_call(
        kern,
        out_shape=jax.ShapeDtypeStruct((nw_tot, t, c), q.dtype),
        grid=grid,
        in_specs=in_specs,
        out_specs=pl.BlockSpec((wb, t, c), lambda w: (w, 0, 0)),
        compiler_params=pltpu.CompilerParams(dimension_semantics=("parallel",)),
    )(*args)


# --------------------------------------------------------------------------------------
# Plain-JAX glue: window partition / shift / masks / relative position index
# --------------------------------------------------------------------------------------

def window_partition(x, ws):
    b, h, w, c = x.shape
    x = x.reshape(b, h // ws, ws, w // ws, ws, c)
    return x.transpose(0, 1, 3, 2, 4, 5).reshape(-1, ws, ws, c)


def window_reverse(windows, ws, h, w):
    b = windows.shape[0] // ((h // ws) * (w // ws))
    x = windows.reshape(b, h // ws, w // ws, ws, ws, -1)
    return x.transpose(0, 1, 3, 2, 4, 5).reshape(b, h, w, -1)


@functools.lru_cache(maxsize=None)
def relative_position_index(ws):
    coords = np.stack(np.meshgrid(np.arange(ws), np.arange(ws), indexing="ij"))
    coords_flat = coords.reshape(2, -1)
    rel = coords_flat[:, :, None] - coords_flat[:, None, :]
    rel = rel.transpose(1, 2, 0).copy()
    rel[:, :, 0] += ws - 1
    rel[:, :, 1] += ws - 1
    rel[:, :, 0] *= 2 * ws - 1
    return rel.sum(-1)  # (ws*ws, ws*ws)


@functools.lru_cache(maxsize=None)
def build_shift_attn_mask(hp, wp, ws, shift):
    img_mask = np.zeros((1, hp, wp, 1), np.float32)
    slices = (slice(0, -ws), slice(-ws, -shift), slice(-shift, None))
    cnt = 0
    for hs in slices:
        for wss in slices:
            img_mask[:, hs, wss, :] = cnt
            cnt += 1
    mw = img_mask.reshape(1, hp // ws, ws, wp // ws, ws, 1)
    mw = mw.transpose(0, 1, 3, 2, 4, 5).reshape(-1, ws * ws)
    attn_mask = mw[:, None, :] - mw[:, :, None]
    return np.where(attn_mask != 0, -100.0, 0.0).astype(np.float32)  # (nW_img, t, t)


# --------------------------------------------------------------------------------------
# Swin layer / patch-merging / stage forward
# --------------------------------------------------------------------------------------

def swin_layer_forward(hidden_states, input_dimensions, p, num_heads, window_size,
                       shift_size, layer_head_mask=None, always_partition=False):
    H, W = input_dimensions
    B, L, C = hidden_states.shape

    if not always_partition and min(H, W) <= window_size:
        shift_size = 0
        window_size = min(H, W)

    shortcut2d = hidden_states.reshape(B * L, C)

    # Fused LN1 + QKV projection (single (C, 3C) matmul). LN + linear are per-token ops,
    # so they commute with the pad/roll/window-partition permutations done afterwards.
    qkv_w = jnp.concatenate([p["q_w"], p["k_w"], p["v_w"]], axis=1)
    qkv_b = jnp.concatenate([p["q_b"], p["k_b"], p["v_b"]], axis=0)
    qkv = dense(shortcut2d, qkv_w, qkv_b, ln=(p["ln1_g"], p["ln1_b"]))  # (B*L, 3C)
    qkv = qkv.reshape(B, H, W, 3 * C)

    pad_b = (window_size - H % window_size) % window_size
    pad_r = (window_size - W % window_size) % window_size
    if pad_b or pad_r:
        qkv = jnp.pad(qkv, ((0, 0), (0, pad_b), (0, pad_r), (0, 0)))
        # reference pads the LN output with zeros *before* the projection -> padded tokens
        # project to the bias vector; reproduce that exactly.
        row_pad = jnp.arange(H + pad_b) >= H
        col_pad = jnp.arange(W + pad_r) >= W
        pad_mask = (row_pad[:, None] | col_pad[None, :])[None, :, :, None]
        qkv = jnp.where(pad_mask, qkv_b.astype(qkv.dtype)[None, None, None, :], qkv)
    Hp, Wp = H + pad_b, W + pad_r

    if shift_size > 0:
        qkv = jnp.roll(qkv, shift=(-shift_size, -shift_size), axis=(1, 2))

    t = window_size * window_size
    qkv_windows = window_partition(qkv, window_size).reshape(-1, t, 3 * C)
    nw_tot = qkv_windows.shape[0]
    q = qkv_windows[..., :C]
    k = qkv_windows[..., C:2 * C]
    v = qkv_windows[..., 2 * C:]

    nW_img = (Hp // window_size) * (Wp // window_size)

    rpi = jnp.asarray(relative_position_index(window_size).reshape(-1))
    rel_bias = p["rel_bias_table"][rpi].reshape(t, t, num_heads)
    rel_bias = rel_bias.transpose(2, 0, 1).astype(jnp.float32)      # (nh, t, t)

    mask = None
    if shift_size > 0:
        mask = jnp.asarray(build_shift_attn_mask(Hp, Wp, window_size, shift_size))

    hd = C // num_heads
    ctx = window_attention(q, k, v, rel_bias, mask, num_heads=num_heads,
                           scale=1.0 / float(np.sqrt(hd)), nw_img=nW_img)  # (nw_tot, t, C)

    if layer_head_mask is not None:
        # scalar-per-head mask multiplies attention probs; equivalent to scaling the
        # per-head context (p*m)@v == m*(p@v).
        # TODO(synk): general (batch, heads, t, t) head masks are not supported.
        lhm = jnp.asarray(layer_head_mask).reshape(-1)
        ctx = ctx * jnp.repeat(lhm, hd)[None, None, :].astype(ctx.dtype)

    # attention output projection
    attn_out = dense(ctx.reshape(nw_tot * t, C), p["proj_w"], p["proj_b"])
    attn_windows = attn_out.reshape(nw_tot, window_size, window_size, C)

    x = window_reverse(attn_windows, window_size, Hp, Wp)
    if shift_size > 0:
        x = jnp.roll(x, shift=(shift_size, shift_size), axis=(1, 2))
    if pad_b or pad_r:
        x = x[:, :H, :W, :]

    h2 = shortcut2d + x.reshape(B * L, C)

    # MLP: fused LN2 + fc1 + GELU, then fc2 with residual fused into the kernel
    y = dense(h2, p["fc1_w"], p["fc1_b"], ln=(p["ln2_g"], p["ln2_b"]), act="gelu")
    out = dense(y, p["fc2_w"], p["fc2_b"], residual=h2)
    return out.reshape(B, L, C)


def patch_merging_forward(x, input_dimensions, p):
    H, W = input_dimensions
    B, L, C = x.shape
    x = x.reshape(B, H, W, C)
    if (H % 2) or (W % 2):
        x = jnp.pad(x, ((0, 0), (0, H % 2), (0, W % 2), (0, 0)))
    x0 = x[:, 0::2, 0::2, :]
    x1 = x[:, 1::2, 0::2, :]
    x2 = x[:, 0::2, 1::2, :]
    x3 = x[:, 1::2, 1::2, :]
    x = jnp.concatenate([x0, x1, x2, x3], axis=-1)
    hd_, wd_ = x.shape[1], x.shape[2]
    x2d = x.reshape(B * hd_ * wd_, 4 * C)
    # fused LN + reduction (reduction has no bias)
    y = dense(x2d, p["red_w"], None, ln=(p["norm_g"], p["norm_b"]))
    return y.reshape(B, hd_ * wd_, 2 * C)


def swin_stage_forward(hidden_states, input_dimensions, params, num_heads, window_size,
                       head_mask=None, output_attentions=False, always_partition=False):
    H, W = input_dimensions
    for i, bp in enumerate(params["blocks"]):
        shift = 0 if i % 2 == 0 else window_size // 2
        layer_head_mask = None if head_mask is None else head_mask[i]
        hidden_states = swin_layer_forward(
            hidden_states, input_dimensions, bp, num_heads, window_size, shift,
            layer_head_mask=layer_head_mask, always_partition=always_partition)

    hidden_states_before_downsampling = hidden_states
    if params["downsample"] is not None:
        hdn, wdn = (H + 1) // 2, (W + 1) // 2
        output_dimensions = (H, W, hdn, wdn)
        hidden_states = patch_merging_forward(
            hidden_states_before_downsampling, input_dimensions, params["downsample"])
    else:
        output_dimensions = (H, W, H, W)

    stage_outputs = (hidden_states, hidden_states_before_downsampling, output_dimensions)
    # TODO(synk): output_attentions=True would require materializing per-window attention
    # probabilities as an extra kernel output; not returned here.
    return stage_outputs


# --------------------------------------------------------------------------------------
# Deterministic parameter init (synthetic; shapes follow TtSwinLayer / SwinPatchMerging)
# --------------------------------------------------------------------------------------

def init_stage_params(key, dim, depth, num_heads, window_size, mlp_ratio=4, downsample=True):
    def dense_w(k, din, dout):
        return 0.02 * jax.random.normal(k, (din, dout), jnp.float32)

    def bias(k, d):
        return 0.01 * jax.random.normal(k, (d,), jnp.float32)

    keys = jax.random.split(key, depth + 1)
    blocks = []
    for i in range(depth):
        bk = jax.random.split(keys[i], 16)
        blocks.append(dict(
            ln1_g=jnp.ones((dim,), jnp.float32), ln1_b=jnp.zeros((dim,), jnp.float32),
            q_w=dense_w(bk[0], dim, dim), q_b=bias(bk[1], dim),
            k_w=dense_w(bk[2], dim, dim), k_b=bias(bk[3], dim),
            v_w=dense_w(bk[4], dim, dim), v_b=bias(bk[5], dim),
            rel_bias_table=0.02 * jax.random.normal(
                bk[6], ((2 * window_size - 1) ** 2, num_heads), jnp.float32),
            proj_w=dense_w(bk[7], dim, dim), proj_b=bias(bk[8], dim),
            ln2_g=jnp.ones((dim,), jnp.float32), ln2_b=jnp.zeros((dim,), jnp.float32),
            fc1_w=dense_w(bk[9], dim, mlp_ratio * dim), fc1_b=bias(bk[10], mlp_ratio * dim),
            fc2_w=dense_w(bk[11], mlp_ratio * dim, dim), fc2_b=bias(bk[12], dim),
        ))
    ds = None
    if downsample:
        ds = dict(
            norm_g=jnp.ones((4 * dim,), jnp.float32),
            norm_b=jnp.zeros((4 * dim,), jnp.float32),
            red_w=dense_w(keys[depth], 4 * dim, 2 * dim),
        )
    return {"blocks": blocks, "downsample": ds}


# --------------------------------------------------------------------------------------

if __name__ == "__main__":
    key = jax.random.PRNGKey(0)
    B, H, W, C = 2, 8, 8, 32
    depth, num_heads, window_size = 2, 4, 4   # block 0 unshifted, block 1 shifted by ws//2

    k_x, k_p = jax.random.split(key)
    hidden_states = jax.random.normal(k_x, (B, H * W, C), jnp.float32)
    params = init_stage_params(k_p, C, depth, num_heads, window_size, downsample=True)

    out, before, output_dims = swin_stage_forward(
        hidden_states, (H, W), params, num_heads, window_size)

    jax.block_until_ready(out)
    jax.block_until_ready(before)

    assert before.shape == (B, H * W, C)
    assert out.shape == (B, ((H + 1) // 2) * ((W + 1) // 2), 2 * C)
    assert output_dims == (H, W, (H + 1) // 2, (W + 1) // 2)
    assert bool(jnp.all(jnp.isfinite(out))) and bool(jnp.all(jnp.isfinite(before)))

    print("KERNEL_OK")
</pallas_src>

<mosaic_0001>
module attributes {stable_mosaic.version = 11 : i64} {
  func.func @_dense_kernel(%arg0: i32, %arg1: memref<128x32xf32, #tpu.memory_space<vmem>>, %arg2: memref<1x32xf32, #tpu.memory_space<vmem>>, %arg3: memref<1x32xf32, #tpu.memory_space<vmem>>, %arg4: memref<32x96xf32, #tpu.memory_space<vmem>>, %arg5: memref<1x96xf32, #tpu.memory_space<vmem>>, %arg6: memref<128x96xf32, #tpu.memory_space<vmem>>) attributes {dimension_semantics = [#tpu.dimension_semantics<parallel>], iteration_bounds = array<i64: 1>, scalar_prefetch = 0 : i64, scratch_operands = 0 : i64, tpu.core_type = #tpu.core_type<tc>, window_params = [{transform_indices = @transform_0, window_bounds = array<i64: 128, 32>}, {pipeline_mode = #tpu.pipeline_mode<synchronous>, transform_indices = @transform_1, window_bounds = array<i64: 1, 32>}, {pipeline_mode = #tpu.pipeline_mode<synchronous>, transform_indices = @transform_2, window_bounds = array<i64: 1, 32>}, {pipeline_mode = #tpu.pipeline_mode<synchronous>, transform_indices = @transform_3, window_bounds = array<i64: 32, 96>}, {pipeline_mode = #tpu.pipeline_mode<synchronous>, transform_indices = @transform_4, window_bounds = array<i64: 1, 96>}, {transform_indices = @transform_5, window_bounds = array<i64: 128, 96>}]} {
    %c0 = arith.constant 0 : index
    %c0_0 = arith.constant 0 : index
    %0 = vector.load %arg1[%c0, %c0_0] : memref<128x32xf32, #tpu.memory_space<vmem>>, vector<128x32xf32>
    %cst = arith.constant dense<0.000000e+00> : vector<128xf32>
    %1 = vector.multi_reduction <add>, %0, %cst [1] : vector<128x32xf32> to vector<128xf32>
    %2 = vector.shape_cast %1 : vector<128xf32> to vector<128x1xf32>
    %cst_1 = arith.constant 3.200000e+01 : f32
    %3 = vector.broadcast %cst_1 : f32 to vector<128x1xf32>
    %4 = arith.divf %2, %3 : vector<128x1xf32>
    %5 = vector.broadcast %4 : vector<128x1xf32> to vector<128x32xf32>
    %6 = arith.subf %0, %5 : vector<128x32xf32>
    %7 = arith.mulf %6, %6 : vector<128x32xf32>
    %cst_2 = arith.constant dense<0.000000e+00> : vector<128xf32>
    %8 = vector.multi_reduction <add>, %7, %cst_2 [1] : vector<128x32xf32> to vector<128xf32>
    %9 = vector.shape_cast %8 : vector<128xf32> to vector<128x1xf32>
    %cst_3 = arith.constant 3.200000e+01 : f32
    %10 = vector.broadcast %cst_3 : f32 to vector<128x1xf32>
    %11 = arith.divf %9, %10 : vector<128x1xf32>
    %12 = vector.broadcast %4 : vector<128x1xf32> to vector<128x32xf32>
    %13 = arith.subf %0, %12 : vector<128x32xf32>
    %cst_4 = arith.constant 9.99999974E-6 : f32
    %14 = vector.broadcast %cst_4 : f32 to vector<128x1xf32>
    %15 = arith.addf %11, %14 : vector<128x1xf32>
    %16 = math.rsqrt %15 : vector<128x1xf32>
    %17 = vector.broadcast %16 : vector<128x1xf32> to vector<128x32xf32>
    %18 = arith.mulf %13, %17 : vector<128x32xf32>
    %c0_5 = arith.constant 0 : index
    %c0_6 = arith.constant 0 : index
    %19 = vector.load %arg2[%c0_5, %c0_6] : memref<1x32xf32, #tpu.memory_space<vmem>>, vector<1x32xf32>
    %20 = vector.broadcast %19 : vector<1x32xf32> to vector<128x32xf32>
    %21 = arith.mulf %18, %20 : vector<128x32xf32>
    %c0_7 = arith.constant 0 : index
    %c0_8 = arith.constant 0 : index
    %22 = vector.load %arg3[%c0_7, %c0_8] : memref<1x32xf32, #tpu.memory_space<vmem>>, vector<1x32xf32>
    %23 = vector.broadcast %22 : vector<1x32xf32> to vector<128x32xf32>
    %24 = arith.addf %21, %23 : vector<128x32xf32>
    %c0_9 = arith.constant 0 : index
    %c0_10 = arith.constant 0 : index
    %25 = vector.load %arg4[%c0_9, %c0_10] : memref<32x96xf32, #tpu.memory_space<vmem>>, vector<32x96xf32>
    %cst_11 = arith.constant dense<0.000000e+00> : vector<128x96xf32>
    %26 = tpu.matmul %24, %25, %cst_11 {dimension_numbers = #tpu.dot_dimension_numbers<[1], [0], [0], [1], [0, 0, 1, 1], [], []>} : vector<128x32xf32>, vector<32x96xf32>, vector<128x96xf32> -> vector<128x96xf32>
    %c0_12 = arith.constant 0 : index
    %c0_13 = arith.constant 0 : index
    %27 = vector.load %arg5[%c0_12, %c0_13] : memref<1x96xf32, #tpu.memory_space<vmem>>, vector<1x96xf32>
    %28 = vector.broadcast %27 : vector<1x96xf32> to vector<128x96xf32>
    %29 = arith.addf %26, %28 : vector<128x96xf32>
    %c0_14 = arith.constant 0 : index
    %c0_15 = arith.constant 0 : index
    %30 = vector.load %arg6[%c0_14, %c0_15] : memref<128x96xf32, #tpu.memory_space<vmem>>, vector<128x96xf32>
    tpu.vector_store %arg6[%c0_14, %c0_15], %29 {strides = array<i32>} : memref<128x96xf32, #tpu.memory_space<vmem>>, vector<128x96xf32>,
    return
  }
  func.func @transform_0(%arg0: i32) -> (i32, i32) {
    %c0_i32 = arith.constant 0 : i32
    %c0_i32_0 = arith.constant 0 : i32
    return %arg0, %c0_i32 : i32, i32
  }
  func.func @transform_1(%arg0: i32) -> (i32, i32) {
    %c0_i32 = arith.constant 0 : i32
    %c0_i32_0 = arith.constant 0 : i32
    %c0_i32_1 = arith.constant 0 : i32
    return %c0_i32, %c0_i32_0 : i32, i32
  }
  func.func @transform_2(%arg0: i32) -> (i32, i32) {
    %c0_i32 = arith.constant 0 : i32
    %c0_i32_0 = arith.constant 0 : i32
    %c0_i32_1 = arith.constant 0 : i32
    return %c0_i32, %c0_i32_0 : i32, i32
  }
  func.func @transform_3(%arg0: i32) -> (i32, i32) {
    %c0_i32 = arith.constant 0 : i32
    %c0_i32_0 = arith.constant 0 : i32
    %c0_i32_1 = arith.constant 0 : i32
    return %c0_i32, %c0_i32_0 : i32, i32
  }
  func.func @transform_4(%arg0: i32) -> (i32, i32) {
    %c0_i32 = arith.constant 0 : i32
    %c0_i32_0 = arith.constant 0 : i32
    %c0_i32_1 = arith.constant 0 : i32
    return %c0_i32, %c0_i32_0 : i32, i32
  }
  func.func @transform_5(%arg0: i32) -> (i32, i32) {
    %c0_i32 = arith.constant 0 : i32
    %c0_i32_0 = arith.constant 0 : i32
    return %arg0, %c0_i32 : i32, i32
  }
}

</mosaic_0001>

<bundles_post_ra>
// kernel: tpu_custom_call.1
= control target key start
LH: loop header
LB: loop body
LE: loop exit
PB: predicated region body
PF: predicated region fallthrough
CT: control target
= control target key end

     0   :  { %vm36_vm0 = vcmask 261120   ;;  %vm496_vm1 = vcmask 785408   ;;  %s999_s0 = inlined_call_operand.vmem [shape: f32[128,32], index: 0, kind: input, shape index: {}]   ;;  %s1000_s3 = inlined_call_operand.vmem [shape: f32[32,96], index: 3, kind: input, shape index: {}]   ;;  %s1001_s1 = inlined_call_operand.vmem [shape: f32[1,32], index: 1, kind: input, shape index: {}]   ;;  %s1002_s2 = inlined_call_operand.vmem [shape: f32[1,32], index: 2, kind: input, shape index: {}]   ;;  %s1003_s4 = inlined_call_operand.vmem [shape: f32[1,96], index: 4, kind: input, shape index: {}]   ;;  %s1004_s5 = inlined_call_operand.vmem [shape: f32[128,96], index: 5, kind: output, shape index: {}]  }
   0x1   :  { %v20_v0 = vld [vmem:[%s999_s0] sm:$0xff]  ;;  %v21_v1 = vld [vmem:[%s999_s0 + $0x8] sm:$0xff]  ;;  %v22_v8 = vld [vmem:[%s999_s0 + $0x10] sm:$0xff] }
   0x2   :  { %v28_v2 = vld [vmem:[%s999_s0 + $0x40] sm:$0xff]  ;;  %v37_v3 = vsel %vm36_vm0, %v20_v0, 0.0  ;;  %v40_v4 = vsel %vm36_vm0, %v21_v1, 0.0  ;;  %v29_v5 = vld [vmem:[%s999_s0 + $0x48] sm:$0xff]  ;;  %v30_v9 = vld [vmem:[%s999_s0 + $0x50] sm:$0xff]  ;;  %v43_v10 = vsel %vm36_vm0, %v22_v8, 0.0 }
   0x3   :  { %38 = vadd.xlane.f32.xlu0 %v37_v3  ;;  %41 = vadd.xlane.f32.xlu1 %v40_v4  ;;  %v61_v6 = vsel %vm36_vm0, %v28_v2, 0.0  ;;  %v64_v7 = vsel %vm36_vm0, %v29_v5, 0.0  ;;  %v67_v11 = vsel %vm36_vm0, %v30_v9, 0.0  ;;  %v689_v12 = vld [vmem:[%s999_s0 + $0x18] sm:$0xff]  ;;  %v703_v16 = vld [vmem:[%s999_s0 + $0x20] sm:$0xff]  ;;  %v717_v20 = vld [vmem:[%s999_s0 + $0x28] sm:$0xff] }
   0x4   :  { %v694_v13 = vld [vmem:[%s999_s0 + $0x58] sm:$0xff]  ;;  %v46_v14 = vsel %vm36_vm0, %v689_v12, 0.0  ;;  %v708_v17 = vld [vmem:[%s999_s0 + $0x60] sm:$0xff]  ;;  %v49_v18 = vsel %vm36_vm0, %v703_v16, 0.0  ;;  %v722_v21 = vld [vmem:[%s999_s0 + $0x68] sm:$0xff]  ;;  %v52_v22 = vsel %vm36_vm0, %v717_v20, 0.0 }
   0x5   :  { %v70_v15 = vsel %vm36_vm0, %v694_v13, 0.0  ;;  %v73_v19 = vsel %vm36_vm0, %v708_v17, 0.0  ;;  %v76_v23 = vsel %vm36_vm0, %v722_v21, 0.0  ;;  %v731_v24 = vld [vmem:[%s999_s0 + $0x30] sm:$0xff]  ;;  %v745_v28 = vld [vmem:[%s999_s0 + $0x38] sm:$0xff] }
   0x6   :  { %v736_v25 = vld [vmem:[%s999_s0 + $0x70] sm:$0xff]  ;;  %v55_v26 = vsel %vm36_vm0, %v731_v24, 0.0  ;;  %v750_v29 = vld [vmem:[%s999_s0 + $0x78] sm:$0xff]  ;;  %v58_v30 = vsel %vm36_vm0, %v745_v28, 0.0 }
   0x7   :  { %62 = vadd.xlane.f32.xlu0 %v61_v6  ;;  %65 = vadd.xlane.f32.xlu1 %v64_v7  ;;  %v79_v27 = vsel %vm36_vm0, %v736_v25, 0.0  ;;  %v82_v31 = vsel %vm36_vm0, %v750_v29, 0.0 }
   0xb   :  { %44 = vadd.xlane.f32.xlu0 %v43_v10  ;;  %68 = vadd.xlane.f32.xlu1 %v67_v11 }
   0xf   :  { %47 = vadd.xlane.f32.xlu0 %v46_v14  ;;  %71 = vadd.xlane.f32.xlu1 %v70_v15 }
  0x13   :  { %50 = vadd.xlane.f32.xlu0 %v49_v18  ;;  %74 = vadd.xlane.f32.xlu1 %v73_v19 }
  0x17   :  { %53 = vadd.xlane.f32.xlu0 %v52_v22  ;;  %77 = vadd.xlane.f32.xlu1 %v76_v23 }
  0x1b   :  { %56 = vadd.xlane.f32.xlu0 %v55_v26  ;;  %80 = vadd.xlane.f32.xlu1 %v79_v27 }
  0x1f   :  { %59 = vadd.xlane.f32.xlu0 %v58_v30  ;;  %83 = vadd.xlane.f32.xlu1 %v82_v31 }
  0x90   :  { %v39_v32 = vpop.xlane.xlu0 %38  ;;  %v42_v33 = vpop.xlane.xlu1 %41 }
  0x91   :  { %v86_v34 = vmul.f32 0.03125, %v39_v32  ;;  %v87_v35 = vmul.f32 0.03125, %v42_v33 }
  0x93   :  { %v756_v36 = vsub.f32 %v20_v0, %v86_v34  ;;  %v758_v37 = vsub.f32 %v21_v1, %v87_v35 }
  0x94   :  { %v63_v38 = vpop.xlane.xlu0 %62  ;;  %v66_v39 = vpop.xlane.xlu1 %65 }
  0x95   :  { %v94_v40 = vmul.f32 0.03125, %v63_v38  ;;  %v95_v41 = vmul.f32 0.03125, %v66_v39  ;;  %v118_v42 = vmul.f32 %v756_v36, %v756_v36  ;;  %v119_v43 = vmul.f32 %v758_v37, %v758_v37 }
  0x97   :  { %v764_v44 = vsub.f32 %v28_v2, %v94_v40  ;;  %v766_v45 = vsub.f32 %v29_v5, %v95_v41  ;;  %v134_v46 = vsel %vm36_vm0, %v118_v42, 0.0  ;;  %v137_v49 = vsel %vm36_vm0, %v119_v43, 0.0 }
  0x98   :  { %135 = vadd.xlane.f32.xlu0 %v134_v46  ;;  %v45_v47 = vpop.xlane.xlu0 %44  ;;  %v69_v48 = vpop.xlane.xlu1 %68 }
  0x99   :  { %v88_v50 = vmul.f32 0.03125, %v45_v47  ;;  %v96_v51 = vmul.f32 0.03125, %v69_v48  ;;  %v126_v52 = vmul.f32 %v764_v44, %v764_v44  ;;  %v127_v53 = vmul.f32 %v766_v45, %v766_v45 }
  0x9b   :  { %v774_v54 = vsub.f32 %v22_v8, %v88_v50  ;;  %v776_v55 = vsub.f32 %v30_v9, %v96_v51  ;;  %v158_v56 = vsel %vm36_vm0, %v126_v52, 0.0  ;;  %v161_v59 = vsel %vm36_vm0, %v127_v53, 0.0  ;;  %v293_v53 = vld [vmem:[%s1000_s3 + $0x8] sm:$0xff] }
  0x9c   :  { %138 = vadd.xlane.f32.xlu0 %v137_v49  ;;  %159 = vadd.xlane.f32.xlu1 %v158_v56  ;;  %v48_v57 = vpop.xlane.xlu0 %47  ;;  %v72_v58 = vpop.xlane.xlu1 %71 }
  0x9d   :  { %v89_v60 = vmul.f32 0.03125, %v48_v57  ;;  %v97_v61 = vmul.f32 0.03125, %v72_v58  ;;  %v120_v62 = vmul.f32 %v774_v54, %v774_v54  ;;  %v128_v63 = vmul.f32 %v776_v55, %v776_v55  ;;  %v294_v57 = vld [vmem:[%s1000_s3 + $0x10] sm:$0xff]  ;;  %v295_v58 = vld [vmem:[%s1000_s3 + $0x18] sm:$0xff] }
  0x9f   :  { %v785_v0 = vsub.f32 %v689_v12, %v89_v60  ;;  %v788_v1 = vsub.f32 %v694_v13, %v97_v61  ;;  %v140_v2 = vsel %vm36_vm0, %v120_v62, 0.0  ;;  %v164_v5 = vsel %vm36_vm0, %v128_v63, 0.0 }
  0xa0   :  { %162 = vadd.xlane.f32.xlu1 %v161_v59  ;;  %141 = vadd.xlane.f32.xlu0 %v140_v2  ;;  %v51_v3 = vpop.xlane.xlu0 %50  ;;  %v75_v4 = vpop.xlane.xlu1 %74  ;;  %v592_v59 = vpack.c.bf16 %v295_v58, %v294_v57 }
  0xa1   :  { %v90_v6 = vmul.f32 0.03125, %v51_v3  ;;  %v98_v7 = vmul.f32 0.03125, %v75_v4  ;;  %v121_v8 = vmul.f32 %v785_v0, %v785_v0  ;;  %v129_v9 = vmul.f32 %v788_v1, %v788_v1 }
  0xa3   :  { %v797_v10 = vsub.f32 %v703_v16, %v90_v6  ;;  %v800_v11 = vsub.f32 %v708_v17, %v98_v7  ;;  %v143_v12 = vsel %vm36_vm0, %v121_v8, 0.0  ;;  %v167_v15 = vsel %vm36_vm0, %v129_v9, 0.0 }
  0xa4   :  { %165 = vadd.xlane.f32.xlu1 %v164_v5  ;;  %144 = vadd.xlane.f32.xlu0 %v143_v12  ;;  %v54_v13 = vpop.xlane.xlu0 %53  ;;  %v78_v14 = vpop.xlane.xlu1 %77 }
  0xa5   :  { %v91_v18 = vmul.f32 0.03125, %v54_v13  ;;  %v99_v19 = vmul.f32 0.03125, %v78_v14  ;;  %v122_v22 = vmul.f32 %v797_v10, %v797_v10  ;;  %v130_v16 = vmul.f32 %v800_v11, %v800_v11 }
  0xa7   :  { %v809_v23 = vsub.f32 %v717_v20, %v91_v18  ;;  %v812_v17 = vsub.f32 %v722_v21, %v99_v19  ;;  %v146_v26 = vsel %vm36_vm0, %v122_v22, 0.0  ;;  %v170_v31 = vsel %vm36_vm0, %v130_v16, 0.0 }
  0xa8   :  { %168 = vadd.xlane.f32.xlu1 %v167_v15  ;;  %147 = vadd.xlane.f32.xlu0 %v146_v26  ;;  %v57_v27 = vpop.xlane.xlu0 %56  ;;  %v81_v30 = vpop.xlane.xlu1 %80 }
  0xa9   :  { %v92_v32 = vmul.f32 0.03125, %v57_v27  ;;  %v100_v33 = vmul.f32 0.03125, %v81_v30  ;;  %v123_v34 = vmul.f32 %v809_v23, %v809_v23  ;;  %v131_v20 = vmul.f32 %v812_v17, %v812_v17  ;;  %v861_v30 = vld [vmem:[%s1001_s1] ss:$0 sm:$0xff] }
  0xab   :  { %v821_v35 = vsub.f32 %v731_v24, %v92_v32  ;;  %v824_v21 = vsub.f32 %v736_v25, %v100_v33  ;;  %v149_v38 = vsel %vm36_vm0, %v123_v34, 0.0  ;;  %v173_v41 = vsel %vm36_vm0, %v131_v20, 0.0 }
  0xac   :  { %171 = vadd.xlane.f32.xlu1 %v170_v31  ;;  %150 = vadd.xlane.f32.xlu0 %v149_v38  ;;  %v60_v39 = vpop.xlane.xlu0 %59  ;;  %v84_v40 = vpop.xlane.xlu1 %83  ;;  %v867_v38 = vld [vmem:[%s1002_s2] ss:$0 sm:$0xff] }
  0xad   :  { %v93_v42 = vmul.f32 0.03125, %v60_v39  ;;  %v101_v43 = vmul.f32 0.03125, %v84_v40  ;;  %v124_v46 = vmul.f32 %v821_v35, %v821_v35  ;;  %v132_v24 = vmul.f32 %v824_v21, %v824_v21 }
  0xaf   :  { %v833_v47 = vsub.f32 %v745_v28, %v93_v42  ;;  %v836_v25 = vsub.f32 %v750_v29, %v101_v43  ;;  %v152_v48 = vsel %vm36_vm0, %v124_v46, 0.0  ;;  %v176_v49 = vsel %vm36_vm0, %v132_v24, 0.0  ;;  %v292_v29 = vld [vmem:[%s1000_s3] sm:$0xff] }
  0xb0   :  { %174 = vadd.xlane.f32.xlu1 %v173_v41  ;;  %153 = vadd.xlane.f32.xlu0 %v152_v48  ;;  %v588_v56 = vpack.c.bf16 %v293_v53, %v292_v29 }
  0xb1   :  { %v125_v50 = vmul.f32 %v833_v47, %v833_v47  ;;  %v133_v51 = vmul.f32 %v836_v25, %v836_v25 }
  0xb2   :  { %589 = vmatprep.subr.bf16.mxu0 %v588_v56  ;;  %596 = vmatprep.subr.bf16.mxu1 %v588_v56 }
  0xb3   :  { %v155_v52 = vsel %vm36_vm0, %v125_v50, 0.0  ;;  %v179_v28 = vsel %vm36_vm0, %v133_v51, 0.0  ;;  %591 = vmatpush3.bf16.msra.mxu0 %v588_v56  ;;  %598 = vmatpush3.bf16.msra.mxu1 %v588_v56 }
  0xb4   :  { %177 = vadd.xlane.f32.xlu1 %v176_v49  ;;  %156 = vadd.xlane.f32.xlu0 %v155_v52 }
  0xb5   :  { %593 = vmatprep.subr.bf16.mxu0 %v592_v59  ;;  %597 = vmatprep.subr.bf16.mxu1 %v592_v59 }
  0xb7   :  { %595 = vmatpush3.bf16.msra.mxu0 %v592_v59  ;;  %599 = vmatpush3.bf16.msra.mxu1 %v592_v59 }
  0xb8   :  { %180 = vadd.xlane.f32.xlu1 %v179_v28 }
 0x125   :  { %v136_v60 = vpop.xlane.xlu0 %135 }
 0x126   :  { %v182_v61 = vmul.f32 0.03125, %v136_v60 }
 0x128   :  { %v198_v62 = vadd.f32 1e-05, %v182_v61 }
 0x129   :  { %v160_v63 = vpop.xlane.xlu1 %159  ;;  %v139_v2 = vpop.xlane.xlu0 %138 }
 0x12a   :  { %600 = vrsqrt.f32 %v198_v62  ;;  %v190_v3 = vmul.f32 0.03125, %v160_v63  ;;  %v183_v4 = vmul.f32 0.03125, %v139_v2 }
 0x12c   :  { %v206_v5 = vadd.f32 1e-05, %v190_v3  ;;  %v199_v6 = vadd.f32 1e-05, %v183_v4 }
 0x12d   :  { %v163_v7 = vpop.xlane.xlu1 %162  ;;  %v142_v8 = vpop.xlane.xlu0 %141 }
 0x12e   :  { %602 = vrsqrt.f32 %v206_v5  ;;  %v191_v9 = vmul.f32 0.03125, %v163_v7  ;;  %v184_v12 = vmul.f32 0.03125, %v142_v8 }
 0x12f   :  { %604 = vrsqrt.f32 %v199_v6 }
 0x130   :  { %v207_v13 = vadd.f32 1e-05, %v191_v9  ;;  %v200_v14 = vadd.f32 1e-05, %v184_v12 }
 0x131   :  { %v166_v15 = vpop.xlane.xlu1 %165  ;;  %v145_v18 = vpop.xlane.xlu0 %144 }
 0x132   :  { %606 = vrsqrt.f32 %v207_v13  ;;  %v192_v19 = vmul.f32 0.03125, %v166_v15  ;;  %v185_v22 = vmul.f32 0.03125, %v145_v18 }
 0x133   :  { %608 = vrsqrt.f32 %v200_v14 }
 0x134   :  { %v601_v16 = vpop.eup %600  ;;  %v208_v26 = vadd.f32 1e-05, %v192_v19  ;;  %v201_v27 = vadd.f32 1e-05, %v185_v22 }
 0x135   :  { %v169_v31 = vpop.xlane.xlu1 %168  ;;  %v148_v32 = vpop.xlane.xlu0 %147  ;;  %v230_v33 = vmul.f32 %v601_v16, %v756_v36 }
 0x136   :  { %610 = vrsqrt.f32 %v208_v26  ;;  %v193_v34 = vmul.f32 0.03125, %v169_v31  ;;  %v186_v20 = vmul.f32 0.03125, %v148_v32 }
 0x137   :  { %612 = vrsqrt.f32 %v201_v27  ;;  %v253_v39 = vmul.f32 %v861_v30, %v230_v33 }
 0x138   :  { %v603_v40 = vpop.eup %602  ;;  %v209_v41 = vadd.f32 1e-05, %v193_v34  ;;  %v202_v42 = vadd.f32 1e-05, %v186_v20 }
 0x139   :  { %v605_v43 = vpop.eup %604  ;;  %v172_v46 = vpop.xlane.xlu1 %171  ;;  %v276_v48 = vadd.f32 %v867_v38, %v253_v39  ;;  %v238_v36 = vmul.f32 %v603_v40, %v764_v44 }
 0x13a   :  { %v151_v24 = vpop.xlane.xlu0 %150  ;;  %614 = vrsqrt.f32 %v209_v41  ;;  %v194_v49 = vmul.f32 0.03125, %v172_v46  ;;  %v231_v51 = vmul.f32 %v605_v43, %v758_v37 }
 0x13b   :  { %v187_v50 = vmul.f32 0.03125, %v151_v24  ;;  %616 = vrsqrt.f32 %v202_v42  ;;  %564 = vmatprep.mubr.msk.f32.mxu0 %vm36_vm0, %v276_v48  ;;  %v261_v52 = vmul.f32 %v861_v30, %v238_v36 }
 0x13c   :  { %v607_v28 = vpop.eup %606  ;;  %v210_v29 = vadd.f32 1e-05, %v194_v49  ;;  %v254_v56 = vmul.f32 %v861_v30, %v231_v51 }
 0x13d   :  { %v203_v53 = vadd.f32 1e-05, %v187_v50  ;;  %v609_v57 = vpop.eup %608  ;;  %v175_v58 = vpop.xlane.xlu1 %174  ;;  %v284_v44 = vadd.f32 %v867_v38, %v261_v52  ;;  %v239_v60 = vmul.f32 %v607_v28, %v766_v45 }
 0x13e   :  { %v154_v59 = vpop.xlane.xlu0 %153  ;;  %618 = vrsqrt.f32 %v210_v29  ;;  %v195_v61 = vmul.f32 0.03125, %v175_v58  ;;  %v277_v62 = vadd.f32 %v867_v38, %v254_v56  ;;  %v232_v63 = vmul.f32 %v609_v57, %v774_v54 }
 0x13f   :  { %v188_v37 = vmul.f32 0.03125, %v154_v59  ;;  %620 = vrsqrt.f32 %v203_v53  ;;  %576 = vmatprep.mubr.msk.f32.mxu1 %vm36_vm0, %v284_v44  ;;  %v262_v2 = vmul.f32 %v861_v30, %v239_v60 }
 0x140   :  { %v611_v3 = vpop.eup %610  ;;  %v211_v4 = vadd.f32 1e-05, %v195_v61  ;;  %565 = vmatmul.mubr.msk.f32.vlgmr.msra.gmra.mrb[0].mxu0 %vm36_vm0, %v277_v62  ;;  %v255_v8 = vmul.f32 %v861_v30, %v232_v63  ;;  %v519_v62 = vld [vmem:[%s1003_s4] ss:$0 sm:$0xff] }
 0x141   :  { %v204_v5 = vadd.f32 1e-05, %v188_v37  ;;  %v613_v6 = vpop.eup %612  ;;  %v178_v7 = vpop.xlane.xlu1 %177  ;;  %v285_v9 = vadd.f32 %v867_v38, %v262_v2  ;;  %v240_v12 = vmul.f32 %v611_v3, %v776_v55 }
 0x142   :  { %v157_v45 = vpop.xlane.xlu0 %156  ;;  %622 = vrsqrt.f32 %v211_v4  ;;  %v196_v13 = vmul.f32 0.03125, %v178_v7  ;;  %v233_v54 = vmul.f32 %v613_v6, %v785_v0  ;;  %v278_v15 = vadd.f32 %v867_v38, %v255_v8 }
 0x143   :  { %v189_v14 = vmul.f32 0.03125, %v157_v45  ;;  %624 = vrsqrt.f32 %v204_v5  ;;  %577 = vmatmul.mubr.msk.f32.vlgmr.msra.gmra.mrb[0].mxu1 %vm36_vm0, %v285_v9  ;;  %v263_v18 = vmul.f32 %v861_v30, %v240_v12 }
 0x144   :  { %v615_v19 = vpop.eup %614  ;;  %v212_v22 = vadd.f32 1e-05, %v196_v13  ;;  %v256_v26 = vmul.f32 %v861_v30, %v233_v54  ;;  %567 = vmatprep.mubr.msk.f32.mxu0 %vm36_vm0, %v278_v15 }
 0x145   :  { %v205_v16 = vadd.f32 1e-05, %v189_v14  ;;  %v617_v27 = vpop.eup %616  ;;  %v181_v55 = vpop.xlane.xlu1 %180  ;;  %v286_v31 = vadd.f32 %v867_v38, %v263_v18  ;;  %v241_v0 = vmul.f32 %v615_v19, %v788_v1 }
 0x146   :  { %626 = vrsqrt.f32 %v212_v22  ;;  %v197_v32 = vmul.f32 0.03125, %v181_v55  ;;  %v279_v33 = vadd.f32 %v867_v38, %v256_v26  ;;  %v234_v34 = vmul.f32 %v617_v27, %v797_v10 }
 0x147   :  { %628 = vrsqrt.f32 %v205_v16  ;;  %579 = vmatprep.mubr.msk.f32.mxu1 %vm36_vm0, %v286_v31  ;;  %v264_v20 = vmul.f32 %v861_v30, %v241_v0 }
 0x148   :  { %v619_v39 = vpop.eup %618  ;;  %v213_v40 = vadd.f32 1e-05, %v197_v32  ;;  %568 = vmatmul.mubr.msk.f32.gmra.mrb[2].mxu0 %vm36_vm0, %v279_v33  ;;  %v257_v41 = vmul.f32 %v861_v30, %v234_v34 }
 0x149   :  { %v621_v42 = vpop.eup %620  ;;  %v287_v1 = vadd.f32 %v867_v38, %v264_v20  ;;  %v242_v43 = vmul.f32 %v619_v39, %v800_v11 }
 0x14a   :  { %630 = vrsqrt.f32 %v213_v40  ;;  %v280_v46 = vadd.f32 %v867_v38, %v257_v41  ;;  %v235_v10 = vmul.f32 %v621_v42, %v809_v23 }
 0x14b   :  { %580 = vmatmul.mubr.msk.f32.gmra.mrb[2].mxu1 %vm36_vm0, %v287_v1  ;;  %v265_v24 = vmul.f32 %v861_v30, %v242_v43 }
 0x14c   :  { %v623_v48 = vpop.eup %622  ;;  %570 = vmatprep.mubr.msk.f32.mxu0 %vm36_vm0, %v280_v46  ;;  %v258_v36 = vmul.f32 %v861_v30, %v235_v10 }
 0x14d   :  { %v625_v49 = vpop.eup %624  ;;  %v288_v50 = vadd.f32 %v867_v38, %v265_v24  ;;  %v243_v51 = vmul.f32 %v623_v48, %v812_v17 }
 0x14e   :  { %v281_v11 = vadd.f32 %v867_v38, %v258_v36  ;;  %v236_v52 = vmul.f32 %v625_v49, %v821_v35 }
 0x14f   :  { %582 = vmatprep.mubr.msk.f32.mxu1 %vm36_vm0, %v288_v50  ;;  %v266_v23 = vmul.f32 %v861_v30, %v243_v51 }
 0x150   :  { %v627_v28 = vpop.eup %626  ;;  %571 = vmatmul.mubr.msk.f32.gmra.mrb[4].mxu0 %vm36_vm0, %v281_v11  ;;  %v259_v29 = vmul.f32 %v861_v30, %v236_v52 }
 0x151   :  { %v629_v53 = vpop.eup %628  ;;  %v289_v56 = vadd.f32 %v867_v38, %v266_v23  ;;  %v244_v57 = vmul.f32 %v627_v28, %v824_v21 }
 0x152   :  { %v282_v17 = vadd.f32 %v867_v38, %v259_v29  ;;  %v237_v58 = vmul.f32 %v629_v53, %v833_v47 }
 0x153   :  { %583 = vmatmul.mubr.msk.f32.gmra.mrb[4].mxu1 %vm36_vm0, %v289_v56  ;;  %v267_v35 = vmul.f32 %v861_v30, %v244_v57 }
 0x154   :  { %v631_v59 = vpop.eup %630  ;;  %573 = vmatprep.mubr.msk.f32.mxu0 %vm36_vm0, %v282_v17  ;;  %v260_v44 = vmul.f32 %v861_v30, %v237_v58 }
 0x155   :  { %v290_v60 = vadd.f32 %v867_v38, %v267_v35  ;;  %v245_v61 = vmul.f32 %v631_v59, %v836_v25 }
 0x156   :  { %v283_v37 = vadd.f32 %v867_v38, %v260_v44 }
 0x157   :  { %585 = vmatprep.mubr.msk.f32.mxu1 %vm36_vm0, %v290_v60  ;;  %v268_v21 = vmul.f32 %v861_v30, %v245_v61 }
 0x158   :  { %574 = vmatmul.mubr.msk.f32.gmra.mrb[6].mxu0 %vm36_vm0, %v283_v37 }
 0x159   :  { %v291_v47 = vadd.f32 %v867_v38, %v268_v21 }
 0x15b   :  { %586 = vmatmul.mubr.msk.f32.gmra.mrb[6].mxu1 %vm36_vm0, %v291_v47 }
 0x213   :  { %v566_v63 = vpop.f32.mrb[0].mxu0 }
 0x214   :  { %v423_v2 = vadd.f32 %v566_v63, %v519_v62  ;;  %v417_v25 = vpop.f32.mrb[1].mxu0 }
 0x215   :  { %v418_v3 = vadd.f32 %v519_v62, %v417_v25 }
 0x216   :  { %498 = vst.msk [vmem:[%s1004_s5 + $0x8] sm:$0xff] %vm496_vm1, %v423_v2  ;;  %v578_v30 = vpop.f32.mrb[0].mxu1 }
 0x217   :  { %497 = vst.msk [vmem:[%s1004_s5] sm:$0xff] %vm496_vm1, %v418_v3  ;;  %v463_v38 = vadd.f32 %v578_v30, %v519_v62  ;;  %v457_v4 = vpop.f32.mrb[1].mxu1 }
 0x218   :  { %v458_v5 = vadd.f32 %v519_v62, %v457_v4 }
 0x219   :  { %506 = vst.msk [vmem:[%s1004_s5 + $0x48] sm:$0xff] %vm496_vm1, %v463_v38 }
 0x21a   :  { %505 = vst.msk [vmem:[%s1004_s5 + $0x40] sm:$0xff] %vm496_vm1, %v458_v5 }
 0x21b   :  { %v569_v6 = vpop.f32.mrb[2].mxu0 }
 0x21c   :  { %v433_v7 = vadd.f32 %v569_v6, %v519_v62  ;;  %v427_v45 = vpop.f32.mrb[3].mxu0 }
 0x21d   :  { %v428_v8 = vadd.f32 %v519_v62, %v427_v45 }
 0x21e   :  { %500 = vst.msk [vmem:[%s1004_s5 + $0x18] sm:$0xff] %vm496_vm1, %v433_v7  ;;  %v581_v9 = vpop.f32.mrb[2].mxu1 }
 0x21f   :  { %499 = vst.msk [vmem:[%s1004_s5 + $0x10] sm:$0xff] %vm496_vm1, %v428_v8  ;;  %v473_v12 = vadd.f32 %v581_v9, %v519_v62  ;;  %v467_v13 = vpop.f32.mrb[3].mxu1 }
 0x220   :  { %v468_v14 = vadd.f32 %v519_v62, %v467_v13 }
 0x221   :  { %508 = vst.msk [vmem:[%s1004_s5 + $0x58] sm:$0xff] %vm496_vm1, %v473_v12 }
 0x222   :  { %507 = vst.msk [vmem:[%s1004_s5 + $0x50] sm:$0xff] %vm496_vm1, %v468_v14 }
 0x223   :  { %v572_v54 = vpop.f32.mrb[4].mxu0 }
 0x224   :  { %v443_v15 = vadd.f32 %v572_v54, %v519_v62  ;;  %v437_v18 = vpop.f32.mrb[5].mxu0 }
 0x225   :  { %v438_v19 = vadd.f32 %v519_v62, %v437_v18 }
 0x226   :  { %502 = vst.msk [vmem:[%s1004_s5 + $0x28] sm:$0xff] %vm496_vm1, %v443_v15  ;;  %v584_v22 = vpop.f32.mrb[4].mxu1 }
 0x227   :  { %501 = vst.msk [vmem:[%s1004_s5 + $0x20] sm:$0xff] %vm496_vm1, %v438_v19  ;;  %v483_v16 = vadd.f32 %v584_v22, %v519_v62  ;;  %v477_v26 = vpop.f32.mrb[5].mxu1 }
 0x228   :  { %v478_v27 = vadd.f32 %v519_v62, %v477_v26 }
 0x229   :  { %510 = vst.msk [vmem:[%s1004_s5 + $0x68] sm:$0xff] %vm496_vm1, %v483_v16 }
 0x22a   :  { %509 = vst.msk [vmem:[%s1004_s5 + $0x60] sm:$0xff] %vm496_vm1, %v478_v27 }
 0x22b   :  { %v575_v55 = vpop.f32.mrb[6].mxu0 }
 0x22c   :  { %v453_v31 = vadd.f32 %v575_v55, %v519_v62  ;;  %v447_v0 = vpop.f32.mrb[7].mxu0 }
 0x22d   :  { %v448_v32 = vadd.f32 %v519_v62, %v447_v0 }
 0x22e   :  { %504 = vst.msk [vmem:[%s1004_s5 + $0x38] sm:$0xff] %vm496_vm1, %v453_v31  ;;  %v587_v33 = vpop.f32.mrb[6].mxu1 }
 0x22f   :  { %503 = vst.msk [vmem:[%s1004_s5 + $0x30] sm:$0xff] %vm496_vm1, %v448_v32  ;;  %v493_v34 = vadd.f32 %v587_v33, %v519_v62  ;;  %v487_v20 = vpop.f32.mrb[7].mxu1 }
 0x230   :  { %v488_v39 = vadd.f32 %v519_v62, %v487_v20 }
 0x231   :  { %512 = vst.msk [vmem:[%s1004_s5 + $0x78] sm:$0xff] %vm496_vm1, %v493_v34 }
 0x232   :  { %511 = vst.msk [vmem:[%s1004_s5 + $0x70] sm:$0xff] %vm496_vm1, %v488_v39 }

</bundles_post_ra>
